<compile_context>
chip_gen: v7x
topology: tpu7x:2x2x1
jax: 0.10.0
libtpu: 0.0.40
codegen_flags: <defaults>
</compile_context>

<pallas_src>
import math

import jax
import jax.numpy as jnp
from jax import lax
from jax.experimental import pallas as pl
from jax.experimental.pallas import tpu as pltpu

# ---- small config (mirrors ModelArgs, shrunk) ----
DIM = 64
N_HEADS = 4
N_KV_HEADS = 2
HEAD_DIM = DIM // N_HEADS           # 16
N_REP = N_HEADS // N_KV_HEADS       # 2
SEQ = 8                             # == max_seq_len (training RoPE table)
BATCH = 2
MULTIPLE_OF = 32
NORM_EPS = 1e-5
ROPE_THETA = 10000.0

Q_DIM = N_HEADS * HEAD_DIM          # 64
KV_DIM = N_KV_HEADS * HEAD_DIM      # 32
QKV_DIM = Q_DIM + 2 * KV_DIM        # 128 -> one vreg lane width
QKV_PAD = 2 * QKV_DIM               # 256 = [q|k|v | q_swap|k_swap|zeros]
ROWS = BATCH * SEQ                  # 16 (batch folded into rows)


def ffn_hidden_dim(dim, multiple_of):
    hidden = 4 * dim
    hidden = int(2 * hidden / 3)
    hidden = (hidden + multiple_of - 1) // multiple_of * multiple_of
    return hidden


FFN_DIM = ffn_hidden_dim(DIM, MULTIPLE_OF)   # 192
FFN_PAD = 256                                # zero-padded to a 128-multiple


# ----------------------------- Pallas kernel -----------------------------
def transformer_block_kernel(
    x_ref, wqkv_ref, wo_ref, w13_ref, w2_ref,
    attn_norm_ref, ff_norm_ref,
    cos_ref, sin_ref, mask_ref, o_ref):
    x = x_ref[...]                       # (R, D) f32, batch folded into rows

    def rmsnorm(v, w):
        ms = jnp.mean(v * v, axis=-1, keepdims=True)
        return (v * lax.rsqrt(ms + NORM_EPS)) * w

    # ---- attention ----
    h = rmsnorm(x, attn_norm_ref[...])
    # fused Q|K|V|Q_swap|K_swap projection: one (R, D) x (D, 256) matmul.
    qkv = jnp.dot(h.astype(jnp.bfloat16), wqkv_ref[...],
                  preferred_element_type=jnp.float32)            # (R, 256)
    # RoPE as a pure VPU mul-add: swap halves already produced by the fused
    # matmul; softmax 1/sqrt(hd) folded into the q cos/sin tables; v lanes
    # pass through (cos = 1, sin = 0 there).
    rot = qkv[:, :QKV_DIM] * cos_ref[...] + qkv[:, QKV_DIM:] * sin_ref[...]
    # rot layout: [q_rot (64) | k_rot (32) | v (32)]

    mask = mask_ref[...]                 # (R, R) additive block-causal mask
    oh_tiles = []
    for g in range(N_KV_HEADS):
        kg = rot[:, Q_DIM + g * HEAD_DIM:Q_DIM + (g + 1) * HEAD_DIM]
        vg = rot[:, Q_DIM + KV_DIM + g * HEAD_DIM:
                 Q_DIM + KV_DIM + (g + 1) * HEAD_DIM]
        kg_b = kg.astype(jnp.bfloat16)
        vg_b = vg.astype(jnp.bfloat16)
        for r in range(N_REP):
            hh = g * N_REP + r                           # repeat_kv mapping
            qh = rot[:, hh * HEAD_DIM:(hh + 1) * HEAD_DIM]
            # s = qh @ kg.T (scale already folded into qh via RoPE tables)
            s = lax.dot_general(qh.astype(jnp.bfloat16), kg_b,
                                (((1,), (1,)), ((), ())),
                                preferred_element_type=jnp.float32) + mask
            m = jnp.max(s, axis=-1, keepdims=True)
            e = jnp.exp(s - m)
            denom = jnp.sum(e, axis=-1, keepdims=True)
            # deferred normalization: scale after the p@v dot, recip on EUP
            oh = jnp.dot(e.astype(jnp.bfloat16), vg_b,
                         preferred_element_type=jnp.float32)      # (R, hd)
            oh_tiles.append(oh * pl.reciprocal(denom, approx=True))
    # lane-pack the 4 head outputs -> one wo matmul (no per-head acc chain)
    attn = jnp.concatenate(oh_tiles, axis=1)                      # (R, 64)
    x1 = x + jnp.dot(attn.astype(jnp.bfloat16), wo_ref[...],
                     preferred_element_type=jnp.float32)

    # ---- feed-forward (SwiGLU), w1|w3 fused, hidden zero-padded to 256 ----
    h2 = rmsnorm(x1, ff_norm_ref[...])
    g13 = jnp.dot(h2.astype(jnp.bfloat16), w13_ref[...],
                  preferred_element_type=jnp.float32)             # (R, 512)
    g1 = g13[:, :FFN_PAD]        # lane-0-aligned
    g3 = g13[:, FFN_PAD:]        # split at lane 256 (128-aligned, no relayout)
    ff_in = g1 * jax.nn.sigmoid(g1) * g3
    ff = jnp.dot(ff_in.astype(jnp.bfloat16), w2_ref[...],
                 preferred_element_type=jnp.float32)

    o_ref[...] = (x1 + ff).astype(o_ref.dtype)


# ----------------------------- wrapper -----------------------------
def transformer_block(x, kernel_params):
    B, S, D = x.shape
    x2 = x.reshape(B * S, D)                 # collapse batch -> one grid step
    args = (x2,) + tuple(kernel_params)

    def full_spec(a):
        nd = a.ndim
        return pl.BlockSpec(a.shape, lambda i, _nd=nd: (0,) * _nd)

    out = pl.pallas_call(
        transformer_block_kernel,
        out_shape=jax.ShapeDtypeStruct((B * S, D), x.dtype),
        grid=(1,),
        in_specs=[full_spec(a) for a in args],
        out_specs=pl.BlockSpec((B * S, D), lambda i: (0, 0)),
        compiler_params=pltpu.CompilerParams(
            dimension_semantics=("arbitrary",)),
    )(*args)
    return out.reshape(B, S, D)


# ------------------- glue: params, RoPE tables, mask -------------------
def rope_tables(head_dim, seq_len, theta):
    inv = 1.0 / (theta ** (jnp.arange(0, head_dim, 2, dtype=jnp.float32) / head_dim))
    ang = jnp.outer(jnp.arange(seq_len, dtype=jnp.float32), inv)   # (S, hd//2)
    cos = jnp.repeat(jnp.cos(ang), 2, axis=-1)                     # (S, hd)
    sin = jnp.repeat(jnp.sin(ang), 2, axis=-1)                     # (S, hd)
    sign = jnp.tile(jnp.array([-1.0, 1.0], jnp.float32), head_dim // 2)
    return cos, sin * sign


def block_causal_mask(batch, seq):
    r = batch * seq
    i = jnp.arange(r)
    bi, si = i // seq, i % seq
    same_batch = bi[:, None] == bi[None, :]
    causal = si[None, :] <= si[:, None]
    # large finite negative (not -inf): robust if a row ever becomes fully masked
    return jnp.where(same_batch & causal, 0.0, -1e30).astype(jnp.float32)


def init_params(key):
    keys = jax.random.split(key, 9)

    def lin(k, out_f, in_f):
        return jax.random.normal(k, (out_f, in_f), jnp.float32) * 0.05

    return dict(
        wq=lin(keys[0], N_HEADS * HEAD_DIM, DIM),
        wk=lin(keys[1], N_KV_HEADS * HEAD_DIM, DIM),
        wv=lin(keys[2], N_KV_HEADS * HEAD_DIM, DIM),
        wo=lin(keys[3], DIM, N_HEADS * HEAD_DIM),
        w1=lin(keys[4], FFN_DIM, DIM),
        w2=lin(keys[5], DIM, FFN_DIM),
        w3=lin(keys[6], FFN_DIM, DIM),
        attn_norm=1.0 + 0.1 * jax.random.normal(keys[7], (DIM,), jnp.float32),
        ff_norm=1.0 + 0.1 * jax.random.normal(keys[8], (DIM,), jnp.float32),
    )


def pack_kernel_params(p):
    # Matmul weights are pre-transposed (kernel computes y = x @ W), fused,
    # zero-padded to 128-lane multiples, and stored bf16 (MXU operands).
    f32, bf16 = jnp.float32, jnp.bfloat16
    wq_t, wk_t, wv_t = p['wq'].T, p['wk'].T, p['wv'].T       # (D,64)(D,32)(D,32)

    # RoPE pair-swap folded into the projection: swapped-pair column copies.
    swap_q = jnp.arange(Q_DIM) ^ 1
    swap_k = jnp.arange(KV_DIM) ^ 1
    wqkv = jnp.concatenate(
        [wq_t, wk_t, wv_t,                       # lanes [0:128]   -> q | k | v
         wq_t[:, swap_q], wk_t[:, swap_k],       # lanes [128:224] -> swaps
         jnp.zeros((DIM, KV_DIM), f32)],         # lanes [224:256] -> pad (v slot)
        axis=1).astype(bf16)                     # (D, 256)

    # fused w1|w3, each zero-padded 192 -> 256 so the kernel split is at 256.
    pad_cols = jnp.zeros((DIM, FFN_PAD - FFN_DIM), f32)
    w13 = jnp.concatenate([p['w1'].T, pad_cols, p['w3'].T, pad_cols],
                          axis=1).astype(bf16)                   # (D, 512)
    w2p = jnp.concatenate(
        [p['w2'].T, jnp.zeros((FFN_PAD - FFN_DIM, DIM), f32)],
        axis=0).astype(bf16)                                     # (256, D)

    cos, sin_signed = rope_tables(HEAD_DIM, SEQ, ROPE_THETA)     # (S, hd)
    scale = 1.0 / math.sqrt(HEAD_DIM)
    # per-lane cos/sin covering [q (scaled) | k | v(pass-through)] lanes
    cos_qkv = jnp.concatenate(
        [jnp.tile(cos, (1, N_HEADS)) * scale,
         jnp.tile(cos, (1, N_KV_HEADS)),
         jnp.ones((SEQ, KV_DIM), f32)], axis=1)                  # (S, 128)
    sin_qkv = jnp.concatenate(
        [jnp.tile(sin_signed, (1, N_HEADS)) * scale,
         jnp.tile(sin_signed, (1, N_KV_HEADS)),
         jnp.zeros((SEQ, KV_DIM), f32)], axis=1)                 # (S, 128)
    cos_qkv = jnp.tile(cos_qkv, (BATCH, 1))                      # (R, 128)
    sin_qkv = jnp.tile(sin_qkv, (BATCH, 1))

    return (
        wqkv, p['wo'].T.astype(bf16), w13, w2p,
        p['attn_norm'][None, :], p['ff_norm'][None, :],
        cos_qkv, sin_qkv,
        block_causal_mask(BATCH, SEQ),
    )


# ---------------- pure-JAX reference (mirrors the torch code) ----------------
def reference_block(x, p):
    B, S, D = x.shape

    def rmsnorm(v, w):
        vf = v.astype(jnp.float32)
        return vf * lax.rsqrt(jnp.mean(vf * vf, -1, keepdims=True) + NORM_EPS) * w

    h = rmsnorm(x, p['attn_norm'])
    xq = (h @ p['wq'].T).reshape(B, S, N_HEADS, HEAD_DIM)
    xk = (h @ p['wk'].T).reshape(B, S, N_KV_HEADS, HEAD_DIM)
    xv = (h @ p['wv'].T).reshape(B, S, N_KV_HEADS, HEAD_DIM)

    inv = 1.0 / (ROPE_THETA ** (jnp.arange(0, HEAD_DIM, 2, dtype=jnp.float32) / HEAD_DIM))
    ang = jnp.outer(jnp.arange(S, dtype=jnp.float32), inv)
    fc = (jnp.cos(ang) + 1j * jnp.sin(ang))[None, :, None, :]

    def rot(t):
        tr = t.reshape(*t.shape[:-1], HEAD_DIM // 2, 2)
        tc = lax.complex(tr[..., 0], tr[..., 1]) * fc
        return jnp.stack([jnp.real(tc), jnp.imag(tc)], axis=-1).reshape(t.shape)

    xq, xk = rot(xq), rot(xk)
    xk = jnp.repeat(xk, N_REP, axis=2)   # repeat_kv
    xv = jnp.repeat(xv, N_REP, axis=2)
    xq, xk, xv = (t.transpose(0, 2, 1, 3) for t in (xq, xk, xv))

    scores = (xq @ xk.transpose(0, 1, 3, 2)) / math.sqrt(HEAD_DIM)
    mask = jnp.where(jnp.triu(jnp.ones((S, S), bool), 1), -jnp.inf, 0.0)
    scores = scores + mask
    attn = jax.nn.softmax(scores, axis=-1) @ xv
    attn = attn.transpose(0, 2, 1, 3).reshape(B, S, -1)
    x1 = x + attn @ p['wo'].T

    h2 = rmsnorm(x1, p['ff_norm'])
    ff = (jax.nn.silu(h2 @ p['w1'].T) * (h2 @ p['w3'].T)) @ p['w2'].T
    return x1 + ff


if __name__ == "__main__":
    key = jax.random.PRNGKey(0)
    kx, kp = jax.random.split(key)
    x = jax.random.normal(kx, (BATCH, SEQ, DIM), jnp.float32)
    p = init_params(kp)

    kernel_params = pack_kernel_params(p)

    out = transformer_block(x, kernel_params)
    out = jax.block_until_ready(out)

    ref = reference_block(x, p)
    assert out.shape == (BATCH, SEQ, DIM)
    assert bool(jnp.all(jnp.isfinite(out)))
    max_err = float(jnp.max(jnp.abs(out - ref)))
    # bf16 MXU operands (f32 accumulation) + approx softmax reciprocal give
    # ~1e-3..1e-2 absolute deviation vs the all-f32 reference; a semantic bug
    # would show up as O(0.1+) error.
    assert max_err < 3e-2, f"max abs error vs reference: {max_err}"

    print("KERNEL_OK")
</pallas_src>

<mosaic_0001>
module attributes {stable_mosaic.version = 11 : i64} {
  func.func @transformer_block_kernel(%arg0: i32, %arg1: memref<16x64xf32, #tpu.memory_space<vmem>>, %arg2: memref<64x256xbf16, #tpu.memory_space<vmem>>, %arg3: memref<64x64xbf16, #tpu.memory_space<vmem>>, %arg4: memref<64x512xbf16, #tpu.memory_space<vmem>>, %arg5: memref<256x64xbf16, #tpu.memory_space<vmem>>, %arg6: memref<1x64xf32, #tpu.memory_space<vmem>>, %arg7: memref<1x64xf32, #tpu.memory_space<vmem>>, %arg8: memref<16x128xf32, #tpu.memory_space<vmem>>, %arg9: memref<16x128xf32, #tpu.memory_space<vmem>>, %arg10: memref<16x16xf32, #tpu.memory_space<vmem>>, %arg11: memref<16x64xf32, #tpu.memory_space<vmem>>) attributes {dimension_semantics = [#tpu.dimension_semantics<arbitrary>], iteration_bounds = array<i64: 1>, scalar_prefetch = 0 : i64, scratch_operands = 0 : i64, tpu.core_type = #tpu.core_type<tc>, window_params = [{pipeline_mode = #tpu.pipeline_mode<synchronous>, transform_indices = @transform_0, window_bounds = array<i64: 16, 64>}, {pipeline_mode = #tpu.pipeline_mode<synchronous>, transform_indices = @transform_1, window_bounds = array<i64: 64, 256>}, {pipeline_mode = #tpu.pipeline_mode<synchronous>, transform_indices = @transform_2, window_bounds = array<i64: 64, 64>}, {pipeline_mode = #tpu.pipeline_mode<synchronous>, transform_indices = @transform_3, window_bounds = array<i64: 64, 512>}, {pipeline_mode = #tpu.pipeline_mode<synchronous>, transform_indices = @transform_4, window_bounds = array<i64: 256, 64>}, {pipeline_mode = #tpu.pipeline_mode<synchronous>, transform_indices = @transform_5, window_bounds = array<i64: 1, 64>}, {pipeline_mode = #tpu.pipeline_mode<synchronous>, transform_indices = @transform_6, window_bounds = array<i64: 1, 64>}, {pipeline_mode = #tpu.pipeline_mode<synchronous>, transform_indices = @transform_7, window_bounds = array<i64: 16, 128>}, {pipeline_mode = #tpu.pipeline_mode<synchronous>, transform_indices = @transform_8, window_bounds = array<i64: 16, 128>}, {pipeline_mode = #tpu.pipeline_mode<synchronous>, transform_indices = @transform_9, window_bounds = array<i64: 16, 16>}, {pipeline_mode = #tpu.pipeline_mode<synchronous>, transform_indices = @transform_10, window_bounds = array<i64: 16, 64>}]} {
    %c0 = arith.constant 0 : index
    %c0_0 = arith.constant 0 : index
    %0 = vector.load %arg1[%c0, %c0_0] : memref<16x64xf32, #tpu.memory_space<vmem>>, vector<16x64xf32>
    %c0_1 = arith.constant 0 : index
    %c0_2 = arith.constant 0 : index
    %1 = vector.load %arg6[%c0_1, %c0_2] : memref<1x64xf32, #tpu.memory_space<vmem>>, vector<1x64xf32>
    %2 = arith.mulf %0, %0 : vector<16x64xf32>
    %cst = arith.constant dense<0.000000e+00> : vector<16xf32>
    %3 = vector.multi_reduction <add>, %2, %cst [1] : vector<16x64xf32> to vector<16xf32>
    %4 = vector.shape_cast %3 : vector<16xf32> to vector<16x1xf32>
    %cst_3 = arith.constant 6.400000e+01 : f32
    %5 = vector.broadcast %cst_3 : f32 to vector<16x1xf32>
    %6 = arith.divf %4, %5 : vector<16x1xf32>
    %cst_4 = arith.constant 9.99999974E-6 : f32
    %7 = vector.broadcast %cst_4 : f32 to vector<16x1xf32>
    %8 = arith.addf %6, %7 : vector<16x1xf32>
    %9 = math.rsqrt %8 : vector<16x1xf32>
    %10 = vector.broadcast %9 : vector<16x1xf32> to vector<16x64xf32>
    %11 = arith.mulf %0, %10 : vector<16x64xf32>
    %12 = vector.broadcast %1 : vector<1x64xf32> to vector<16x64xf32>
    %13 = arith.mulf %11, %12 : vector<16x64xf32>
    %14 = arith.truncf %13 : vector<16x64xf32> to vector<16x64xbf16>
    %c0_5 = arith.constant 0 : index
    %c0_6 = arith.constant 0 : index
    %15 = vector.load %arg2[%c0_5, %c0_6] : memref<64x256xbf16, #tpu.memory_space<vmem>>, vector<64x256xbf16>
    %cst_7 = arith.constant dense<0.000000e+00> : vector<16x256xf32>
    %16 = tpu.matmul %14, %15, %cst_7 {dimension_numbers = #tpu.dot_dimension_numbers<[1], [0], [0], [1], [0, 0, 1, 1], [], []>} : vector<16x64xbf16>, vector<64x256xbf16>, vector<16x256xf32> -> vector<16x256xf32>
    %17 = vector.extract_strided_slice %16 {offsets = [0, 0], sizes = [16, 128], strides = [1, 1]} : vector<16x256xf32> to vector<16x128xf32>
    %c0_8 = arith.constant 0 : index
    %c0_9 = arith.constant 0 : index
    %18 = vector.load %arg8[%c0_8, %c0_9] : memref<16x128xf32, #tpu.memory_space<vmem>>, vector<16x128xf32>
    %19 = arith.mulf %17, %18 : vector<16x128xf32>
    %20 = vector.extract_strided_slice %16 {offsets = [0, 128], sizes = [16, 128], strides = [1, 1]} : vector<16x256xf32> to vector<16x128xf32>
    %c0_10 = arith.constant 0 : index
    %c0_11 = arith.constant 0 : index
    %21 = vector.load %arg9[%c0_10, %c0_11] : memref<16x128xf32, #tpu.memory_space<vmem>>, vector<16x128xf32>
    %22 = arith.mulf %20, %21 : vector<16x128xf32>
    %23 = arith.addf %19, %22 : vector<16x128xf32>
    %c0_12 = arith.constant 0 : index
    %c0_13 = arith.constant 0 : index
    %24 = vector.load %arg10[%c0_12, %c0_13] : memref<16x16xf32, #tpu.memory_space<vmem>>, vector<16x16xf32>
    %25 = vector.extract_strided_slice %23 {offsets = [0, 64], sizes = [16, 16], strides = [1, 1]} : vector<16x128xf32> to vector<16x16xf32>
    %26 = vector.extract_strided_slice %23 {offsets = [0, 96], sizes = [16, 16], strides = [1, 1]} : vector<16x128xf32> to vector<16x16xf32>
    %27 = arith.truncf %25 : vector<16x16xf32> to vector<16x16xbf16>
    %28 = arith.truncf %26 : vector<16x16xf32> to vector<16x16xbf16>
    %29 = vector.extract_strided_slice %23 {offsets = [0, 0], sizes = [16, 16], strides = [1, 1]} : vector<16x128xf32> to vector<16x16xf32>
    %30 = arith.truncf %29 : vector<16x16xf32> to vector<16x16xbf16>
    %cst_14 = arith.constant dense<0.000000e+00> : vector<16x16xf32>
    %31 = tpu.matmul %30, %27, %cst_14 {dimension_numbers = #tpu.dot_dimension_numbers<[1], [1], [0], [0], [0, 0, 1, 0], [], []>} : vector<16x16xbf16>, vector<16x16xbf16>, vector<16x16xf32> -> vector<16x16xf32>
    %32 = arith.addf %31, %24 : vector<16x16xf32>
    %cst_15 = arith.constant dense<0xFF800000> : vector<16xf32>
    %33 = vector.multi_reduction <maximumf>, %32, %cst_15 [1] : vector<16x16xf32> to vector<16xf32>
    %34 = vector.shape_cast %33 : vector<16xf32> to vector<16x1xf32>
    %35 = vector.broadcast %34 : vector<16x1xf32> to vector<16x16xf32>
    %36 = arith.subf %32, %35 : vector<16x16xf32>
    %37 = math.exp %36 : vector<16x16xf32>
    %cst_16 = arith.constant dense<0.000000e+00> : vector<16xf32>
    %38 = vector.multi_reduction <add>, %37, %cst_16 [1] : vector<16x16xf32> to vector<16xf32>
    %39 = vector.shape_cast %38 : vector<16xf32> to vector<16x1xf32>
    %40 = arith.truncf %37 : vector<16x16xf32> to vector<16x16xbf16>
    %cst_17 = arith.constant dense<0.000000e+00> : vector<16x16xf32>
    %41 = tpu.matmul %40, %28, %cst_17 {dimension_numbers = #tpu.dot_dimension_numbers<[1], [0], [0], [1], [0, 0, 1, 1], [], []>} : vector<16x16xbf16>, vector<16x16xbf16>, vector<16x16xf32> -> vector<16x16xf32>
    %42 = tpu.reciprocal %39 {approx = true} : vector<16x1xf32> -> vector<16x1xf32>
    %43 = vector.broadcast %42 : vector<16x1xf32> to vector<16x16xf32>
    %44 = arith.mulf %41, %43 : vector<16x16xf32>
    %45 = vector.extract_strided_slice %23 {offsets = [0, 16], sizes = [16, 16], strides = [1, 1]} : vector<16x128xf32> to vector<16x16xf32>
    %46 = arith.truncf %45 : vector<16x16xf32> to vector<16x16xbf16>
    %cst_18 = arith.constant dense<0.000000e+00> : vector<16x16xf32>
    %47 = tpu.matmul %46, %27, %cst_18 {dimension_numbers = #tpu.dot_dimension_numbers<[1], [1], [0], [0], [0, 0, 1, 0], [], []>} : vector<16x16xbf16>, vector<16x16xbf16>, vector<16x16xf32> -> vector<16x16xf32>
    %48 = arith.addf %47, %24 : vector<16x16xf32>
    %cst_19 = arith.constant dense<0xFF800000> : vector<16xf32>
    %49 = vector.multi_reduction <maximumf>, %48, %cst_19 [1] : vector<16x16xf32> to vector<16xf32>
    %50 = vector.shape_cast %49 : vector<16xf32> to vector<16x1xf32>
    %51 = vector.broadcast %50 : vector<16x1xf32> to vector<16x16xf32>
    %52 = arith.subf %48, %51 : vector<16x16xf32>
    %53 = math.exp %52 : vector<16x16xf32>
    %cst_20 = arith.constant dense<0.000000e+00> : vector<16xf32>
    %54 = vector.multi_reduction <add>, %53, %cst_20 [1] : vector<16x16xf32> to vector<16xf32>
    %55 = vector.shape_cast %54 : vector<16xf32> to vector<16x1xf32>
    %56 = arith.truncf %53 : vector<16x16xf32> to vector<16x16xbf16>
    %cst_21 = arith.constant dense<0.000000e+00> : vector<16x16xf32>
    %57 = tpu.matmul %56, %28, %cst_21 {dimension_numbers = #tpu.dot_dimension_numbers<[1], [0], [0], [1], [0, 0, 1, 1], [], []>} : vector<16x16xbf16>, vector<16x16xbf16>, vector<16x16xf32> -> vector<16x16xf32>
    %58 = tpu.reciprocal %55 {approx = true} : vector<16x1xf32> -> vector<16x1xf32>
    %59 = vector.broadcast %58 : vector<16x1xf32> to vector<16x16xf32>
    %60 = arith.mulf %57, %59 : vector<16x16xf32>
    %61 = vector.extract_strided_slice %23 {offsets = [0, 80], sizes = [16, 16], strides = [1, 1]} : vector<16x128xf32> to vector<16x16xf32>
    %62 = vector.extract_strided_slice %23 {offsets = [0, 112], sizes = [16, 16], strides = [1, 1]} : vector<16x128xf32> to vector<16x16xf32>
    %63 = arith.truncf %61 : vector<16x16xf32> to vector<16x16xbf16>
    %64 = arith.truncf %62 : vector<16x16xf32> to vector<16x16xbf16>
    %65 = vector.extract_strided_slice %23 {offsets = [0, 32], sizes = [16, 16], strides = [1, 1]} : vector<16x128xf32> to vector<16x16xf32>
    %66 = arith.truncf %65 : vector<16x16xf32> to vector<16x16xbf16>
    %cst_22 = arith.constant dense<0.000000e+00> : vector<16x16xf32>
    %67 = tpu.matmul %66, %63, %cst_22 {dimension_numbers = #tpu.dot_dimension_numbers<[1], [1], [0], [0], [0, 0, 1, 0], [], []>} : vector<16x16xbf16>, vector<16x16xbf16>, vector<16x16xf32> -> vector<16x16xf32>
    %68 = arith.addf %67, %24 : vector<16x16xf32>
    %cst_23 = arith.constant dense<0xFF800000> : vector<16xf32>
    %69 = vector.multi_reduction <maximumf>, %68, %cst_23 [1] : vector<16x16xf32> to vector<16xf32>
    %70 = vector.shape_cast %69 : vector<16xf32> to vector<16x1xf32>
    %71 = vector.broadcast %70 : vector<16x1xf32> to vector<16x16xf32>
    %72 = arith.subf %68, %71 : vector<16x16xf32>
    %73 = math.exp %72 : vector<16x16xf32>
    %cst_24 = arith.constant dense<0.000000e+00> : vector<16xf32>
    %74 = vector.multi_reduction <add>, %73, %cst_24 [1] : vector<16x16xf32> to vector<16xf32>
    %75 = vector.shape_cast %74 : vector<16xf32> to vector<16x1xf32>
    %76 = arith.truncf %73 : vector<16x16xf32> to vector<16x16xbf16>
    %cst_25 = arith.constant dense<0.000000e+00> : vector<16x16xf32>
    %77 = tpu.matmul %76, %64, %cst_25 {dimension_numbers = #tpu.dot_dimension_numbers<[1], [0], [0], [1], [0, 0, 1, 1], [], []>} : vector<16x16xbf16>, vector<16x16xbf16>, vector<16x16xf32> -> vector<16x16xf32>
    %78 = tpu.reciprocal %75 {approx = true} : vector<16x1xf32> -> vector<16x1xf32>
    %79 = vector.broadcast %78 : vector<16x1xf32> to vector<16x16xf32>
    %80 = arith.mulf %77, %79 : vector<16x16xf32>
    %81 = vector.extract_strided_slice %23 {offsets = [0, 48], sizes = [16, 16], strides = [1, 1]} : vector<16x128xf32> to vector<16x16xf32>
    %82 = arith.truncf %81 : vector<16x16xf32> to vector<16x16xbf16>
    %cst_26 = arith.constant dense<0.000000e+00> : vector<16x16xf32>
    %83 = tpu.matmul %82, %63, %cst_26 {dimension_numbers = #tpu.dot_dimension_numbers<[1], [1], [0], [0], [0, 0, 1, 0], [], []>} : vector<16x16xbf16>, vector<16x16xbf16>, vector<16x16xf32> -> vector<16x16xf32>
    %84 = arith.addf %83, %24 : vector<16x16xf32>
    %cst_27 = arith.constant dense<0xFF800000> : vector<16xf32>
    %85 = vector.multi_reduction <maximumf>, %84, %cst_27 [1] : vector<16x16xf32> to vector<16xf32>
    %86 = vector.shape_cast %85 : vector<16xf32> to vector<16x1xf32>
    %87 = vector.broadcast %86 : vector<16x1xf32> to vector<16x16xf32>
    %88 = arith.subf %84, %87 : vector<16x16xf32>
    %89 = math.exp %88 : vector<16x16xf32>
    %cst_28 = arith.constant dense<0.000000e+00> : vector<16xf32>
    %90 = vector.multi_reduction <add>, %89, %cst_28 [1] : vector<16x16xf32> to vector<16xf32>
    %91 = vector.shape_cast %90 : vector<16xf32> to vector<16x1xf32>
    %92 = arith.truncf %89 : vector<16x16xf32> to vector<16x16xbf16>
    %cst_29 = arith.constant dense<0.000000e+00> : vector<16x16xf32>
    %93 = tpu.matmul %92, %64, %cst_29 {dimension_numbers = #tpu.dot_dimension_numbers<[1], [0], [0], [1], [0, 0, 1, 1], [], []>} : vector<16x16xbf16>, vector<16x16xbf16>, vector<16x16xf32> -> vector<16x16xf32>
    %94 = tpu.reciprocal %91 {approx = true} : vector<16x1xf32> -> vector<16x1xf32>
    %95 = vector.broadcast %94 : vector<16x1xf32> to vector<16x16xf32>
    %96 = arith.mulf %93, %95 : vector<16x16xf32>
    %97 = tpu.concatenate %44, %60, %80, %96 in 1 : vector<16x16xf32>, vector<16x16xf32>, vector<16x16xf32>, vector<16x16xf32> -> vector<16x64xf32>
    %98 = arith.truncf %97 : vector<16x64xf32> to vector<16x64xbf16>
    %c0_30 = arith.constant 0 : index
    %c0_31 = arith.constant 0 : index
    %99 = vector.load %arg3[%c0_30, %c0_31] : memref<64x64xbf16, #tpu.memory_space<vmem>>, vector<64x64xbf16>
    %cst_32 = arith.constant dense<0.000000e+00> : vector<16x64xf32>
    %100 = tpu.matmul %98, %99, %cst_32 {dimension_numbers = #tpu.dot_dimension_numbers<[1], [0], [0], [1], [0, 0, 1, 1], [], []>} : vector<16x64xbf16>, vector<64x64xbf16>, vector<16x64xf32> -> vector<16x64xf32>
    %101 = arith.addf %0, %100 : vector<16x64xf32>
    %c0_33 = arith.constant 0 : index
    %c0_34 = arith.constant 0 : index
    %102 = vector.load %arg7[%c0_33, %c0_34] : memref<1x64xf32, #tpu.memory_space<vmem>>, vector<1x64xf32>
    %103 = arith.mulf %101, %101 : vector<16x64xf32>
    %cst_35 = arith.constant dense<0.000000e+00> : vector<16xf32>
    %104 = vector.multi_reduction <add>, %103, %cst_35 [1] : vector<16x64xf32> to vector<16xf32>
    %105 = vector.shape_cast %104 : vector<16xf32> to vector<16x1xf32>
    %cst_36 = arith.constant 6.400000e+01 : f32
    %106 = vector.broadcast %cst_36 : f32 to vector<16x1xf32>
    %107 = arith.divf %105, %106 : vector<16x1xf32>
    %cst_37 = arith.constant 9.99999974E-6 : f32
    %108 = vector.broadcast %cst_37 : f32 to vector<16x1xf32>
    %109 = arith.addf %107, %108 : vector<16x1xf32>
    %110 = math.rsqrt %109 : vector<16x1xf32>
    %111 = vector.broadcast %110 : vector<16x1xf32> to vector<16x64xf32>
    %112 = arith.mulf %101, %111 : vector<16x64xf32>
    %113 = vector.broadcast %102 : vector<1x64xf32> to vector<16x64xf32>
    %114 = arith.mulf %112, %113 : vector<16x64xf32>
    %115 = arith.truncf %114 : vector<16x64xf32> to vector<16x64xbf16>
    %c0_38 = arith.constant 0 : index
    %c0_39 = arith.constant 0 : index
    %116 = vector.load %arg4[%c0_38, %c0_39] : memref<64x512xbf16, #tpu.memory_space<vmem>>, vector<64x512xbf16>
    %cst_40 = arith.constant dense<0.000000e+00> : vector<16x512xf32>
    %117 = tpu.matmul %115, %116, %cst_40 {dimension_numbers = #tpu.dot_dimension_numbers<[1], [0], [0], [1], [0, 0, 1, 1], [], []>} : vector<16x64xbf16>, vector<64x512xbf16>, vector<16x512xf32> -> vector<16x512xf32>
    %118 = vector.extract_strided_slice %117 {offsets = [0, 0], sizes = [16, 256], strides = [1, 1]} : vector<16x512xf32> to vector<16x256xf32>
    %119 = vector.extract_strided_slice %117 {offsets = [0, 256], sizes = [16, 256], strides = [1, 1]} : vector<16x512xf32> to vector<16x256xf32>
    %120 = arith.negf %118 : vector<16x256xf32>
    %121 = math.exp %120 : vector<16x256xf32>
    %cst_41 = arith.constant 1.000000e+00 : f32
    %122 = vector.broadcast %cst_41 : f32 to vector<16x256xf32>
    %123 = arith.addf %122, %121 : vector<16x256xf32>
    %124 = arith.divf %122, %123 : vector<16x256xf32>
    %125 = arith.mulf %118, %124 : vector<16x256xf32>
    %126 = arith.mulf %125, %119 : vector<16x256xf32>
    %127 = arith.truncf %126 : vector<16x256xf32> to vector<16x256xbf16>
    %c0_42 = arith.constant 0 : index
    %c0_43 = arith.constant 0 : index
    %128 = vector.load %arg5[%c0_42, %c0_43] : memref<256x64xbf16, #tpu.memory_space<vmem>>, vector<256x64xbf16>
    %cst_44 = arith.constant dense<0.000000e+00> : vector<16x64xf32>
    %129 = tpu.matmul %127, %128, %cst_44 {dimension_numbers = #tpu.dot_dimension_numbers<[1], [0], [0], [1], [0, 0, 1, 1], [], []>} : vector<16x256xbf16>, vector<256x64xbf16>, vector<16x64xf32> -> vector<16x64xf32>
    %130 = arith.addf %101, %129 : vector<16x64xf32>
    %c0_45 = arith.constant 0 : index
    %c0_46 = arith.constant 0 : index
    %131 = vector.load %arg11[%c0_45, %c0_46] : memref<16x64xf32, #tpu.memory_space<vmem>>, vector<16x64xf32>
    tpu.vector_store %arg11[%c0_45, %c0_46], %130 {strides = array<i32>} : memref<16x64xf32, #tpu.memory_space<vmem>>, vector<16x64xf32>,
    return
  }
  func.func @transform_0(%arg0: i32) -> (i32, i32) {
    %c0_i32 = arith.constant 0 : i32
    %c0_i32_0 = arith.constant 0 : i32
    %c0_i32_1 = arith.constant 0 : i32
    return %c0_i32, %c0_i32_0 : i32, i32
  }
  func.func @transform_1(%arg0: i32) -> (i32, i32) {
    %c0_i32 = arith.constant 0 : i32
    %c0_i32_0 = arith.constant 0 : i32
    %c0_i32_1 = arith.constant 0 : i32
    return %c0_i32, %c0_i32_0 : i32, i32
  }
  func.func @transform_2(%arg0: i32) -> (i32, i32) {
    %c0_i32 = arith.constant 0 : i32
    %c0_i32_0 = arith.constant 0 : i32
    %c0_i32_1 = arith.constant 0 : i32
    return %c0_i32, %c0_i32_0 : i32, i32
  }
  func.func @transform_3(%arg0: i32) -> (i32, i32) {
    %c0_i32 = arith.constant 0 : i32
    %c0_i32_0 = arith.constant 0 : i32
    %c0_i32_1 = arith.constant 0 : i32
    return %c0_i32, %c0_i32_0 : i32, i32
  }
  func.func @transform_4(%arg0: i32) -> (i32, i32) {
    %c0_i32 = arith.constant 0 : i32
    %c0_i32_0 = arith.constant 0 : i32
    %c0_i32_1 = arith.constant 0 : i32
    return %c0_i32, %c0_i32_0 : i32, i32
  }
  func.func @transform_5(%arg0: i32) -> (i32, i32) {
    %c0_i32 = arith.constant 0 : i32
    %c0_i32_0 = arith.constant 0 : i32
    %c0_i32_1 = arith.constant 0 : i32
    return %c0_i32, %c0_i32_0 : i32, i32
  }
  func.func @transform_6(%arg0: i32) -> (i32, i32) {
    %c0_i32 = arith.constant 0 : i32
    %c0_i32_0 = arith.constant 0 : i32
    %c0_i32_1 = arith.constant 0 : i32
    return %c0_i32, %c0_i32_0 : i32, i32
  }
  func.func @transform_7(%arg0: i32) -> (i32, i32) {
    %c0_i32 = arith.constant 0 : i32
    %c0_i32_0 = arith.constant 0 : i32
    %c0_i32_1 = arith.constant 0 : i32
    return %c0_i32, %c0_i32_0 : i32, i32
  }
  func.func @transform_8(%arg0: i32) -> (i32, i32) {
    %c0_i32 = arith.constant 0 : i32
    %c0_i32_0 = arith.constant 0 : i32
    %c0_i32_1 = arith.constant 0 : i32
    return %c0_i32, %c0_i32_0 : i32, i32
  }
  func.func @transform_9(%arg0: i32) -> (i32, i32) {
    %c0_i32 = arith.constant 0 : i32
    %c0_i32_0 = arith.constant 0 : i32
    %c0_i32_1 = arith.constant 0 : i32
    return %c0_i32, %c0_i32_0 : i32, i32
  }
  func.func @transform_10(%arg0: i32) -> (i32, i32) {
    %c0_i32 = arith.constant 0 : i32
    %c0_i32_0 = arith.constant 0 : i32
    %c0_i32_1 = arith.constant 0 : i32
    return %c0_i32, %c0_i32_0 : i32, i32
  }
}

</mosaic_0001>

<bundles_post_ra>
// kernel: tpu_custom_call.1
= control target key start
LH: loop header
LB: loop body
LE: loop exit
PB: predicated region body
PF: predicated region fallthrough
CT: control target
= control target key end

     0   :  { %15 = vsyncpa [#allocation3], 0  ;;  %s2020_s0 = inlined_call_operand.hbm [shape: f32[16,64], index: 0, kind: input, shape index: {}]   ;;  %s2021_s1 = inlined_call_operand.vmem [shape: bf16[64,256], index: 1, kind: input, shape index: {}]   ;;  %s2022_s2 = inlined_call_operand.hbm [shape: bf16[64,64], index: 2, kind: input, shape index: {}]   ;;  %s2023_s3 = inlined_call_operand.vmem [shape: bf16[64,512], index: 3, kind: input, shape index: {}]   ;;  %s2024_s4 = inlined_call_operand.vmem [shape: bf16[256,64], index: 4, kind: input, shape index: {}]   ;;  %s2025_s5 = inlined_call_operand.vmem [shape: f32[1,64], index: 5, kind: input, shape index: {}]   ;;  %s2026_s6 = inlined_call_operand.vmem [shape: f32[1,64], index: 6, kind: input, shape index: {}]   ;;  %s2027_s7 = inlined_call_operand.vmem [shape: f32[16,128], index: 7, kind: input, shape index: {}]   ;;  %s2028_s8 = inlined_call_operand.hbm [shape: f32[16,128], index: 8, kind: input, shape index: {}]   ;;  %s2029_s9 = inlined_call_operand.vmem [shape: f32[16,16], index: 9, kind: input, shape index: {}]   ;;  %s2030_s10 = inlined_call_operand.hbm [shape: f32[16,64], index: 10, kind: output, shape index: {}]  }
   0x1   :  { %16 = vsyncpa [#allocation6], 0 }
   0x2   :  { %17 = vsyncpa [#allocation4], 0  ;;  %s1633_s13 = smov [#allocation5]   ;;  %s1539_s17 = scalar_lea.hbm %s2022_s2, 512 }
   0x3   :  { %s37_s14 = sshll.u32 %s1633_s13, 4  ;;  %p1540_p0 = scmp.ne.s32.totalorder %s2022_s2, %s1539_s17  ;;  %s38_s14 = int_to_ptr.vmem [resolvable:$true] %s37_s14 }
   0x4   :  { %p1543_p1 = scmp.lt.u32.totalorder %s1539_s17, %s2022_s2 }
   0x6   :  { %p1545_p2 = pnand %p1543_p1, %p1540_p0 }
   0x8   :  { %1548 = shalt.err (!%p1545_p2)
}
   0x9   :  { %s1549_s22 = scalar_lea.vmem %s38_s14, 512  ;;  %p1554_p4 = scmp.lt.s32.totalorder %s38_s14, %s38_s14 }
   0xa   :  { %p1550_p3 = scmp.ne.s32.totalorder %s38_s14, %s1549_s22  ;;  %p1555_p5 = scmp.lt.s32.totalorder %s1549_s22, %s1549_s22 }
   0xc   :  { %p1556_p6 = por %p1555_p5, %p1554_p4 }
   0xe   :  { %p1557_p7 = pnand %p1556_p6, %p1550_p3 }
  0x10   :  { %1560 = shalt.err (!%p1557_p7)
}
  0x11   :  { %s1634_s23 = smov 64   ;;  %s1635_s24 = smov 4  }
  0x12   :  { %43 = dma.hbm_to_vmem [thread:$0]  %s2022_s2, 512, %s38_s14, [#allocation6], %s1634_s23, %s1634_s23, %s1635_s24  }
  0x13   :  { %s1636_s27 = smov [#allocation2]   ;;  %s1561_s11 = scalar_lea.hbm %s2020_s0, 256 }
  0x14   :  { %s23_s28 = sshll.u32 %s1636_s27, 4  ;;  %p1562_p8 = scmp.ne.s32.totalorder %s2020_s0, %s1561_s11  ;;  %s24_s28 = int_to_ptr.vmem [resolvable:$true] %s23_s28 }
  0x15   :  { %p1565_p9 = scmp.lt.u32.totalorder %s1561_s11, %s2020_s0 }
  0x17   :  { %p1567_p10 = pnand %p1565_p9, %p1562_p8 }
  0x19   :  { %1570 = shalt.err (!%p1567_p10)
}
  0x1a   :  { %s1571_s17 = scalar_lea.vmem %s24_s28, 256  ;;  %p1576_p12 = scmp.lt.s32.totalorder %s24_s28, %s24_s28 }
  0x1b   :  { %p1572_p11 = scmp.ne.s32.totalorder %s24_s28, %s1571_s17  ;;  %p1577_p13 = scmp.lt.s32.totalorder %s1571_s17, %s1571_s17 }
  0x1d   :  { %p1578_p0 = por %p1577_p13, %p1576_p12 }
  0x1f   :  { %p1579_p1 = pnand %p1578_p0, %p1572_p11 }
  0x21   :  { %1582 = shalt.err (!%p1579_p1)
}
  0x22   :  { %s1637_s2 = smov 128   ;;  %s1638_s14 = smov 8  }
  0x23   :  { %29 = dma.hbm_to_vmem [thread:$0]  %s2020_s0, 256, %s24_s28, [#allocation3], %s1637_s2, %s1637_s2, %s1638_s14  }
  0x24   :  { %s1639_s20 = smov [#allocation7]   ;;  %s1583_s25 = scalar_lea.hbm %s2028_s8, 256 }
  0x25   :  { %s59_s21 = sshll.u32 %s1639_s20, 4  ;;  %p1584_p2 = scmp.ne.s32.totalorder %s2028_s8, %s1583_s25  ;;  %s60_s21 = int_to_ptr.vmem [resolvable:$true] %s59_s21 }
  0x26   :  { %p1587_p3 = scmp.lt.u32.totalorder %s1583_s25, %s2028_s8 }
  0x28   :  { %p1589_p4 = pnand %p1587_p3, %p1584_p2 }
  0x2a   :  { %1592 = shalt.err (!%p1589_p4)
}
  0x2b   :  { %s1593_s11 = scalar_lea.vmem %s60_s21, 256  ;;  %p1598_p6 = scmp.lt.s32.totalorder %s60_s21, %s60_s21 }
  0x2c   :  { %p1594_p5 = scmp.ne.s32.totalorder %s60_s21, %s1593_s11  ;;  %p1599_p7 = scmp.lt.s32.totalorder %s1593_s11, %s1593_s11 }
  0x2e   :  { %p1600_p8 = por %p1599_p7, %p1598_p6 }
  0x30   :  { %p1601_p9 = pnand %p1600_p8, %p1594_p5 }
  0x32   :  { %1604 = shalt.err (!%p1601_p9)
}
  0x33   :  { %65 = dma.hbm_to_vmem [thread:$0]  %s2028_s8, 256, %s60_s21, [#allocation6], %s1637_s2, %s1637_s2, %s1638_s14  }
  0x34   :  { %1627 = dma.done.wait [#allocation3], 256  }
  0x35   :  { %1628 = vsyncadd [#allocation3], 4294967040 }
  0x36   :  { %1629 = dma.done.wait [#allocation6], 768  }
  0x37   :  { %1630 = vsyncadd [#allocation6], 4294966528  ;;  %v1749_v0 = vld [vmem:[#allocation2] sm:$0xff]  ;;  %vm83_vm0 = vcmask 523264   ;;  %v1751_v1 = vld [vmem:[#allocation2 + $0x8] sm:$0xff]  ;;  %v1640_v11 = vmov 0  }
  0x38   :  { %v81_v2 = vmul.f32 %v1749_v0, %v1749_v0  ;;  %v82_v3 = vmul.f32 %v1751_v1, %v1751_v1  ;;  %v1427_v6 = vld [vmem:[%s2021_s1 + $0x4] ss:$8 sps:$4 sm:$0xff]   ;;  %v1429_v7 = vld [vmem:[%s2021_s1] ss:$8 sps:$4 sm:$0xff]   ;;  %v1430_v8 = vld [vmem:[%s2021_s1 + $0x14] ss:$8 sps:$4 sm:$0xff]   ;;  %191 = vmatprep.mubr.bf16.mxu0 %v1640_v11 }
  0x39   :  { %159 = vmatprep.subr.bf16.mxu0 %v1427_v6  ;;  %v1432_v9 = vld [vmem:[%s2021_s1 + $0x10] ss:$8 sps:$4 sm:$0xff]   ;;  %v1433_v10 = vld [vmem:[%s2021_s1 + $0x24] ss:$8 sps:$4 sm:$0xff]   ;;  %v1435_v12 = vld [vmem:[%s2021_s1 + $0x20] ss:$8 sps:$4 sm:$0xff]  }
  0x3a   :  { %v84_v4 = vsel %vm83_vm0, %v81_v2, 0.0  ;;  %v87_v5 = vsel %vm83_vm0, %v82_v3, 0.0  ;;  %160 = vmatpush1.bf16.msra.mxu0 %v1429_v7  ;;  %v1436_v13 = vld [vmem:[%s2021_s1 + $0x34] ss:$8 sps:$4 sm:$0xff]   ;;  %v1438_v14 = vld [vmem:[%s2021_s1 + $0x30] ss:$8 sps:$4 sm:$0xff]  }
  0x3b   :  { %85 = vadd.xlane.f32.xlu0 %v84_v4  ;;  %161 = vmatprep.subr.bf16.mxu0 %v1430_v8  ;;  %v1230_v24 = vld [vmem:[%s2025_s5] ss:$0 sm:$0xff]  ;;  %v1641_v29 = vmov 0.0   ;;  %v206_v31 = vld [vmem:[#allocation7] sm:$0xff]  ;;  %v203_v33 = vld [vmem:[%s2027_s7 + $0x8] sm:$0xff]  ;;  %vm1642_vm1 = vmmov 0  }
  0x3c   :  { %1341 = vmatprep.subr.bf16.mxu1 %v1641_v29  ;;  %v202_v30 = vld [vmem:[%s2027_s7] sm:$0xff]  ;;  %v207_v36 = vld [vmem:[#allocation7 + $0x8] sm:$0xff]  ;;  %1343 = vmatprep.mubr.msk.bf16.mxu1 %vm1642_vm1, %v1641_v29  ;;  %s1643_s7 = smov 48   ;;  %s1644_s8 = smov 112   ;;  %vm218_vm2 = vcmask 130048   ;;  %v213_v54 = vld [vmem:[%s2029_s9 + $0x8] sm:$0xff] }
  0x3d   :  { %s1645_s12 = smov 96   ;;  %s1646_s13 = smov 80   ;;  %v212_v52 = vld [vmem:[%s2029_s9] sm:$0xff]  ;;  %vm709_vm3 = vcmask 261120   ;;  %vm712_vm4 = vcmask 392192  }
  0x3e   :  { %162 = vmatpush1.bf16.msra.mxu0 %v1432_v9  ;;  %s1647_s9 = smov 32   ;;  %s1648_s18 = smov 16  }
  0x3f   :  { %88 = vadd.xlane.f32.xlu0 %v87_v5  ;;  %163 = vmatprep.subr.bf16.mxu0 %v1433_v10 }
  0x42   :  { %164 = vmatpush1.bf16.msra.mxu0 %v1435_v12 }
  0x43   :  { %165 = vmatprep.subr.bf16.mxu0 %v1436_v13 }
  0x46   :  { %166 = vmatpush1.bf16.msra.mxu0 %v1438_v14 }
  0x47   :  { %1335 = vmatprep.subr.bf16.mxu0 %v1641_v29 }
  0xc8   :  { %v86_v15 = vpop.xlane.xlu0 %85 }
  0xc9   :  { %v91_v16 = vmul.f32 0.015625, %v86_v15 }
  0xcb   :  { %v93_v17 = vadd.f32 1e-05, %v91_v16 }
  0xcc   :  { %v89_v18 = vpop.xlane.xlu0 %88 }
  0xcd   :  { %1483 = vrsqrt.f32 %v93_v17  ;;  %v92_v19 = vmul.f32 0.015625, %v89_v18 }
  0xcf   :  { %v94_v20 = vadd.f32 1e-05, %v92_v19 }
  0xd1   :  { %1485 = vrsqrt.f32 %v94_v20 }
  0xd7   :  { %v1484_v21 = vpop.eup %1483 }
  0xd8   :  { %v97_v22 = vmul.f32 %v1484_v21, %v1749_v0 }
  0xda   :  { %v105_v26 = vmul.f32 %v1230_v24, %v97_v22 }
  0xdb   :  { %v1486_v23 = vpop.eup %1485 }
  0xdc   :  { %v98_v25 = vmul.f32 %v1486_v23, %v1751_v1 }
  0xde   :  { %v106_v27 = vmul.f32 %v1230_v24, %v98_v25 }
  0xe0   :  { %v107_v28 = vpack.c.bf16 %v106_v27, %v105_v26 }
  0xe2   :  { %1239 = vmatmul.mubr.msk.bf16.vlgmr.msra.gmra.mrb[0].mxu0 %vm83_vm0, %v107_v28 }
  0xe3   :  { %1337 = vmatprep.mubr.msk.bf16.mxu0 %vm1642_vm1, %v1641_v29 }
 0x1b5   :  { %v193_v32 = vpop.f32.mrb[0].mxu0 }
 0x1b6   :  { %v204_v34 = vmul.f32 %v202_v30, %v193_v32  ;;  %v195_v35 = vpop.f32.mrb[1].mxu0 }
 0x1b7   :  { %v208_v37 = vmul.f32 %v206_v31, %v195_v35  ;;  %v197_v38 = vpop.f32.mrb[2].mxu0 }
 0x1b8   :  { %v205_v39 = vmul.f32 %v203_v33, %v197_v38  ;;  %v199_v40 = vpop.f32.mrb[3].mxu0 }
 0x1b9   :  { %v210_v41 = vadd.f32 %v208_v37, %v204_v34  ;;  %v209_v42 = vmul.f32 %v207_v36, %v199_v40 }
 0x1bb   :  { %v211_v43 = vadd.f32 %v209_v42, %v205_v39 }
 0x1bd   :  { %v1802_v44 = vpack.c.bf16 %v211_v43, %v210_v41 }
 0x1bf   :  { %451 = vrot.lane.b32.xlu0 %v1802_v44, %s1643_s7  ;;  %216 = vrot.lane.b32.xlu1 %v1802_v44, %s1634_s23 }
 0x1c3   :  { %336 = vrot.lane.b32.xlu1 %v1802_v44, %s1644_s8 }
 0x1c7   :  { %449 = vrot.lane.b32.xlu1 %v1802_v44, %s1645_s12 }
 0x1cb   :  { %570 = vrot.lane.b32.xlu1 %v1802_v44, %s1646_s13 }
 0x231   :  { %v217_v45 = vpop.permute.xlu1 %216  ;;  %v452_v47 = vpop.permute.xlu0 %451 }
 0x232   :  { %v223_v46 = vsel %vm218_vm2, %v217_v45, 0  ;;  %v457_v49 = vsel %vm218_vm2, %v452_v47, 0 }
 0x233   :  { %1336 = vmatpush3.bf16.xpose.msra.mxu0 %v223_v46 }
 0x234   :  { %1347 = vmatprep.subr.bf16.mxu0 %v1641_v29 }
 0x235   :  { %v337_v48 = vpop.permute.xlu1 %336 }
 0x239   :  { %v450_v50 = vpop.permute.xlu1 %449 }
 0x23a   :  { %1338 = vmatmul.mubr.msk.bf16.vlgmr.msra.gmra.mrb[4].mxu0 %vm218_vm2, %v1802_v44 }
 0x23b   :  { %1348 = vmatpush3.bf16.xpose.msra.mxu0 %v223_v46  ;;  %1349 = vmatprep.mubr.msk.bf16.mxu0 %vm1642_vm1, %v1641_v29 }
 0x23c   :  { %1359 = vmatprep.subr.bf16.mxu0 %v1641_v29 }
 0x23d   :  { %v571_v51 = vpop.permute.xlu1 %570 }
 0x242   :  { %1350 = vmatmul.mubr.msk.bf16.vlgmr.msra.gmra.mrb[8].mxu0 %vm218_vm2, %v337_v48 }
 0x243   :  { %1360 = vmatpush3.bf16.xpose.msra.mxu0 %v457_v49  ;;  %1361 = vmatprep.mubr.msk.bf16.mxu0 %vm1642_vm1, %v1641_v29 }
 0x244   :  { %1371 = vmatprep.subr.bf16.mxu0 %v1641_v29 }
 0x24a   :  { %1362 = vmatmul.mubr.msk.bf16.vlgmr.msra.gmra.mrb[12].mxu0 %vm218_vm2, %v450_v50 }
 0x24b   :  { %1372 = vmatpush3.bf16.xpose.msra.mxu0 %v457_v49  ;;  %1373 = vmatprep.mubr.msk.bf16.mxu0 %vm1642_vm1, %v1641_v29 }
 0x24c   :  { %1383 = vmatprep.subr.bf16.mxu0 %v1641_v29 }
 0x252   :  { %1374 = vmatmul.mubr.msk.bf16.vlgmr.msra.gmra.mrb[16].mxu0 %vm218_vm2, %v571_v51 }
 0x253   :  { %1391 = vmatprep.mubr.msk.bf16.mxu0 %vm1642_vm1, %v1641_v29 }
 0x30d   :  { %v259_v53 = vpop.f32.mrb[4].mxu0 }
 0x30e   :  { %v260_v55 = vadd.f32 %v259_v53, %v212_v52  ;;  %v1339_v56 = vpop.f32.mrb[5].mxu0 }
 0x30f   :  { %v262_v57 = vpop.f32.mrb[6].mxu0 }
 0x310   :  { %v263_v58 = vadd.f32 %v262_v57, %v213_v54  ;;  %v1340_v59 = vpop.f32.mrb[7].mxu0  ;;  %v266_v60 = vsel %vm218_vm2, %v260_v55, -inf }
 0x311   :  { %267 = vmax.xlane.f32.xlu1 %v266_v60 }
 0x312   :  { %v269_v61 = vsel %vm218_vm2, %v263_v58, -inf }
 0x313   :  { %270 = vmax.xlane.f32.xlu0 %v269_v61 }
 0x315   :  { %v375_v62 = vpop.f32.mrb[8].mxu0 }
 0x316   :  { %v376_v63 = vadd.f32 %v375_v62, %v212_v52  ;;  %v1351_v2 = vpop.f32.mrb[9].mxu0 }
 0x317   :  { %v378_v3 = vpop.f32.mrb[10].mxu0 }
 0x318   :  { %v379_v4 = vadd.f32 %v378_v3, %v213_v54  ;;  %v1352_v5 = vpop.f32.mrb[11].mxu0  ;;  %v382_v6 = vsel %vm218_vm2, %v376_v63, -inf }
 0x319   :  { %383 = vmax.xlane.f32.xlu1 %v382_v6 }
 0x31a   :  { %v385_v7 = vsel %vm218_vm2, %v379_v4, -inf }
 0x31d   :  { %386 = vmax.xlane.f32.xlu1 %v385_v7  ;;  %v493_v8 = vpop.f32.mrb[12].mxu0 }
 0x31e   :  { %v494_v9 = vadd.f32 %v493_v8, %v212_v52  ;;  %v1363_v10 = vpop.f32.mrb[13].mxu0 }
 0x31f   :  { %v496_v12 = vpop.f32.mrb[14].mxu0 }
 0x320   :  { %v497_v13 = vadd.f32 %v496_v12, %v213_v54  ;;  %v1364_v14 = vpop.f32.mrb[15].mxu0  ;;  %v500_v15 = vsel %vm218_vm2, %v494_v9, -inf }
 0x321   :  { %501 = vmax.xlane.f32.xlu1 %v500_v15 }
 0x322   :  { %v503_v16 = vsel %vm218_vm2, %v497_v13, -inf }
 0x323   :  { %504 = vmax.xlane.f32.xlu0 %v503_v16 }
 0x325   :  { %v609_v17 = vpop.f32.mrb[16].mxu0 }
 0x326   :  { %v610_v18 = vadd.f32 %v609_v17, %v212_v52  ;;  %v1375_v19 = vpop.f32.mrb[17].mxu0 }
 0x327   :  { %v612_v20 = vpop.f32.mrb[18].mxu0 }
 0x328   :  { %v613_v21 = vadd.f32 %v612_v20, %v213_v54  ;;  %v1376_v22 = vpop.f32.mrb[19].mxu0  ;;  %v616_v23 = vsel %vm218_vm2, %v610_v18, -inf }
 0x329   :  { %617 = vmax.xlane.f32.xlu1 %v616_v23 }
 0x32a   :  { %v619_v24 = vsel %vm218_vm2, %v613_v21, -inf }
 0x32b   :  { %620 = vmax.xlane.f32.xlu0 %v619_v24 }
 0x33a   :  { %285 = vrot.lane.b32.xlu1 %v1802_v44, %s1647_s9 }
 0x341   :  { %519 = vrot.lane.b32.xlu0 %v1802_v44, %s1648_s18 }
 0x39e   :  { %v268_v25 = vpop.xlane.xlu1 %267 }
 0x39f   :  { %v272_v31 = vsub.f32 %v260_v55, %v268_v25 }
 0x3a0   :  { %v271_v26 = vpop.xlane.xlu0 %270 }
 0x3a1   :  { %v273_v27 = vsub.f32 %v263_v58, %v271_v26  ;;  %v274_v36 = vmul.f32 1.442695, %v272_v31 }
 0x3a3   :  { %v276_v33 = vmul.f32 1.442695, %v273_v27 }
 0x3a6   :  { %v384_v28 = vpop.xlane.xlu1 %383 }
 0x3a7   :  { %v388_v30 = vsub.f32 %v376_v63, %v384_v28  ;;  %v1440_v28 = vld [vmem:[#allocation5 + $0x8] sm:$0xff]  }
 0x3a9   :  { %v390_v32 = vmul.f32 1.442695, %v388_v30 }
 0x3aa   :  { %v387_v34 = vpop.xlane.xlu1 %386 }
 0x3ab   :  { %1487 = vpow2.f32 %v390_v32  ;;  %v389_v35 = vsub.f32 %v379_v4, %v387_v34 }
 0x3ac   :  { %1489 = vpow2.f32 %v276_v33  ;;  %v1441_v33 = vld [vmem:[#allocation5 + $0x10] sm:$0xff]  }
 0x3ad   :  { %v392_v37 = vmul.f32 1.442695, %v389_v35 }
 0x3ae   :  { %v502_v38 = vpop.xlane.xlu1 %501 }
 0x3af   :  { %1491 = vpow2.f32 %v392_v37  ;;  %v506_v39 = vsub.f32 %v494_v9, %v502_v38 }
 0x3b0   :  { %v505_v40 = vpop.xlane.xlu0 %504  ;;  %1493 = vpow2.f32 %v274_v36 }
 0x3b1   :  { %v508_v41 = vmul.f32 1.442695, %v506_v39  ;;  %v507_v42 = vsub.f32 %v497_v13, %v505_v40 }
 0x3b3   :  { %1495 = vpow2.f32 %v508_v41  ;;  %v510_v43 = vmul.f32 1.442695, %v507_v42  ;;  %v1442_v42 = vld [vmem:[#allocation5 + $0x18] sm:$0xff]  }
 0x3b5   :  { %v1488_v44 = vpop.eup %1487  ;;  %1497 = vpow2.f32 %v510_v43 }
 0x3b6   :  { %v618_v45 = vpop.xlane.xlu1 %617  ;;  %v394_v46 = vsel %vm218_vm2, %v1488_v44, 0.0  ;;  %v1490_v48 = vpop.eup %1489 }
 0x3b7   :  { %v622_v47 = vsub.f32 %v610_v18, %v618_v45  ;;  %395 = vadd.xlane.f32.xlu1 %v394_v46  ;;  %v281_v7 = vsel %vm218_vm2, %v1490_v48, 0.0  ;;  %v1439_v18 = vld [vmem:[#allocation5] sm:$0xff]  }
 0x3b8   :  { %v621_v49 = vpop.xlane.xlu0 %620  ;;  %1384 = vmatpush3.bf16.msra.mxu0 %v1439_v18 }
 0x3b9   :  { %v1492_v50 = vpop.eup %1491  ;;  %v624_v51 = vmul.f32 1.442695, %v622_v47  ;;  %v623_v52 = vsub.f32 %v613_v21, %v621_v49  ;;  %1385 = vmatprep.subr.bf16.mxu0 %v1641_v29 }
 0x3ba   :  { %v286_v53 = vpop.permute.xlu1 %285  ;;  %v397_v54 = vsel %vm218_vm2, %v1492_v50, 0.0  ;;  %v1494_v55 = vpop.eup %1493  ;;  %v400_v62 = vpack.c.bf16 %v1492_v50, %v1488_v44 }
 0x3bb   :  { %1499 = vpow2.f32 %v624_v51  ;;  %v626_v56 = vmul.f32 1.442695, %v623_v52  ;;  %398 = vadd.xlane.f32.xlu0 %v397_v54  ;;  %1342 = vmatpush3.bf16.msra.mxu1 %v286_v53  ;;  %v284_v57 = vpack.c.bf16 %v1490_v48, %v1494_v55  ;;  %v278_v6 = vsel %vm218_vm2, %v1494_v55, 0.0 }
 0x3bc   :  { %1353 = vmatprep.subr.bf16.mxu1 %v1641_v29  ;;  %v520_v2 = vpop.permute.xlu0 %519  ;;  %1386 = vmatpush3.bf16.msra.mxu0 %v1440_v28  ;;  %v1457_v28 = vld [vmem:[%s2023_s3 + $0x44] ss:$16 sps:$4 sm:$0xff]  }
 0x3bd   :  { %v1496_v58 = vpop.eup %1495  ;;  %1501 = vpow2.f32 %v626_v56  ;;  %1387 = vmatprep.subr.bf16.mxu0 %v1641_v29 }
 0x3be   :  { %1344 = vmatmul.mubr.msk.bf16.vlgmr.msra.gmra.mrb[0].mxu1 %vm218_vm2, %v284_v57  ;;  %v512_v59 = vsel %vm218_vm2, %v1496_v58, 0.0 }
 0x3bf   :  { %v1498_v60 = vpop.eup %1497  ;;  %513 = vadd.xlane.f32.xlu1 %v512_v59  ;;  %1354 = vmatpush3.bf16.msra.mxu1 %v286_v53 }
 0x3c0   :  { %v515_v61 = vsel %vm218_vm2, %v1498_v60, 0.0  ;;  %1355 = vmatprep.mubr.msk.bf16.mxu1 %vm1642_vm1, %v1641_v29  ;;  %1365 = vmatprep.subr.bf16.mxu1 %v1641_v29  ;;  %v518_v8 = vpack.c.bf16 %v1498_v60, %v1496_v58 }
 0x3c1   :  { %516 = vadd.xlane.f32.xlu0 %v515_v61  ;;  %1388 = vmatpush3.bf16.msra.mxu0 %v1441_v33  ;;  %v1463_v33 = vld [vmem:[%s2023_s3 + $0x64] ss:$16 sps:$4 sm:$0xff]  }
 0x3c2   :  { %1389 = vmatprep.subr.bf16.mxu0 %v1641_v29 }
 0x3c5   :  { %v1500_v63 = vpop.eup %1499  ;;  %1390 = vmatpush3.bf16.msra.mxu0 %v1442_v42 }
 0x3c6   :  { %1356 = vmatmul.mubr.msk.bf16.vlgmr.msra.gmra.mrb[4].mxu1 %vm218_vm2, %v400_v62  ;;  %v628_v3 = vsel %vm218_vm2, %v1500_v63, 0.0 }
 0x3c7   :  { %v1502_v4 = vpop.eup %1501  ;;  %1366 = vmatpush3.bf16.msra.mxu1 %v520_v2  ;;  %629 = vadd.xlane.f32.xlu1 %v628_v3 }
 0x3c8   :  { %v631_v5 = vsel %vm218_vm2, %v1502_v4, 0.0  ;;  %1367 = vmatprep.mubr.msk.bf16.mxu1 %vm1642_vm1, %v1641_v29  ;;  %1377 = vmatprep.subr.bf16.mxu1 %v1641_v29  ;;  %v634_v9 = vpack.c.bf16 %v1502_v4, %v1500_v63 }
 0x3c9   :  { %632 = vadd.xlane.f32.xlu0 %v631_v5 }
 0x3cb   :  { %279 = vadd.xlane.f32.xlu1 %v278_v6 }
 0x3cd   :  { %282 = vadd.xlane.f32.xlu0 %v281_v7 }
 0x3ce   :  { %1368 = vmatmul.mubr.msk.bf16.vlgmr.msra.gmra.mrb[8].mxu1 %vm218_vm2, %v518_v8 }
 0x3cf   :  { %1378 = vmatpush3.bf16.msra.mxu1 %v520_v2  ;;  %1379 = vmatprep.mubr.msk.bf16.mxu1 %vm1642_vm1, %v1641_v29 }
 0x3d6   :  { %1380 = vmatmul.mubr.msk.bf16.vlgmr.msra.gmra.mrb[12].mxu1 %vm218_vm2, %v634_v9 }
 0x3d7   :  { %951 = vmatprep.mubr.bf16.mxu1 %v1640_v11 }
 0x444   :  { %v396_v10 = vpop.xlane.xlu1 %395 }
 0x445   :  { %1503 = vrcp.f32 %v396_v10 }
 0x448   :  { %v399_v12 = vpop.xlane.xlu0 %398 }
 0x449   :  { %1505 = vrcp.f32 %v399_v12 }
 0x44c   :  { %v514_v17 = vpop.xlane.xlu1 %513 }
 0x44d   :  { %1507 = vrcp.f32 %v514_v17 }
 0x44e   :  { %v517_v19 = vpop.xlane.xlu0 %516 }
 0x44f   :  { %1509 = vrcp.f32 %v517_v19  ;;  %v1504_v21 = vpop.eup %1503 }
 0x453   :  { %v1506_v23 = vpop.eup %1505 }
 0x454   :  { %v630_v30 = vpop.xlane.xlu1 %629 }
 0x455   :  { %1511 = vrcp.f32 %v630_v30  ;;  %v1460_v30 = vld [vmem:[%s2023_s3 + $0x4c] ss:$16 sps:$4 sm:$0xff]  }
 0x456   :  { %v633_v31 = vpop.xlane.xlu0 %632 }
 0x457   :  { %1513 = vrcp.f32 %v633_v31  ;;  %v1508_v35 = vpop.eup %1507  ;;  %v1455_v31 = vld [vmem:[%s2023_s3 + $0x40] ss:$16 sps:$4 sm:$0xff]  }
 0x458   :  { %v280_v29 = vpop.xlane.xlu1 %279 }
 0x459   :  { %v1510_v37 = vpop.eup %1509  ;;  %1515 = vrcp.f32 %v280_v29  ;;  %v1469_v29 = vld [vmem:[%s2024_s4 + $0x48] sm:$0xff]  }
 0x45a   :  { %v283_v53 = vpop.xlane.xlu0 %282 }
 0x45b   :  { %1517 = vrcp.f32 %v283_v53  ;;  %v1470_v53 = vld [vmem:[%s2024_s4 + $0x8] sm:$0xff]  }
 0x45f   :  { %v1512_v45 = vpop.eup %1511 }
 0x461   :  { %v1514_v47 = vpop.eup %1513 }
 0x463   :  { %v1516_v56 = vpop.eup %1515 }
 0x465   :  { %v1518_v59 = vpop.eup %1517 }
 0x491   :  { %v1870_v13 = vpop.f32.mrb[0].mxu1 }
 0x492   :  { %v1345_v14 = vpop.f32.mrb[1].mxu1  ;;  %v334_v62 = vmul.f32 %v1516_v56, %v1870_v13  ;;  %v1473_v56 = vld [vmem:[%s2024_s4 + $0x58] sm:$0xff]  }
 0x493   :  { %v1872_v15 = vpop.f32.mrb[2].mxu1 }
 0x494   :  { %v1346_v16 = vpop.f32.mrb[3].mxu1  ;;  %v335_v63 = vmul.f32 %v1518_v59, %v1872_v15  ;;  %v1476_v59 = vld [vmem:[%s2024_s4 + $0x20] sm:$0xff]  }
 0x499   :  { %v438_v20 = vpop.f32.mrb[4].mxu1 }
 0x49a   :  { %v1357_v22 = vpop.f32.mrb[5].mxu1  ;;  %v447_v25 = vmul.f32 %v1504_v21, %v438_v20 }
 0x49b   :  { %v441_v24 = vpop.f32.mrb[6].mxu1  ;;  %v1443_v22 = vld [vmem:[%s2023_s3] ss:$16 sps:$4 sm:$0xff]  }
 0x49c   :  { %v448_v26 = vmul.f32 %v1506_v23, %v441_v24  ;;  %v1358_v27 = vpop.f32.mrb[7].mxu1  ;;  %v1446_v23 = vld [vmem:[%s2023_s3 + $0x8] ss:$16 sps:$4 sm:$0xff]   ;;  %v1451_v24 = vld [vmem:[%s2023_s3 + $0x24] ss:$16 sps:$4 sm:$0xff]  }
 0x49d   :  { %v1452_v27 = vld [vmem:[%s2023_s3 + $0x28] ss:$16 sps:$4 sm:$0xff]  }
 0x49e   :  { %v1412_v32 = vpack.i.bf16 %v448_v26, %v447_v25  ;;  %v1454_v25 = vld [vmem:[%s2023_s3 + $0x2c] ss:$16 sps:$4 sm:$0xff]   ;;  %v1449_v26 = vld [vmem:[%s2023_s3 + $0x20] ss:$16 sps:$4 sm:$0xff]  }
 0x4a0   :  { %1413 = vrot.lane.b32.xlu1 %v1412_v32, %s1648_s18  ;;  %v1458_v32 = vld [vmem:[%s2023_s3 + $0x48] ss:$16 sps:$4 sm:$0xff]  }
 0x4a1   :  { %v559_v34 = vpop.f32.mrb[8].mxu1 }
 0x4a2   :  { %v1369_v36 = vpop.f32.mrb[9].mxu1  ;;  %v568_v39 = vmul.f32 %v1508_v35, %v559_v34  ;;  %v1466_v34 = vld [vmem:[%s2023_s3 + $0x6c] ss:$16 sps:$4 sm:$0xff]   ;;  %v1461_v35 = vld [vmem:[%s2023_s3 + $0x60] ss:$16 sps:$4 sm:$0xff]  }
 0x4a3   :  { %v562_v38 = vpop.f32.mrb[10].mxu1  ;;  %v1464_v36 = vld [vmem:[%s2023_s3 + $0x68] ss:$16 sps:$4 sm:$0xff]  }
 0x4a4   :  { %v569_v40 = vmul.f32 %v1510_v37, %v562_v38  ;;  %v1370_v41 = vpop.f32.mrb[11].mxu1 }
 0x4a6   :  { %v1417_v43 = vpack.i.bf16 %v569_v40, %v568_v39 }
 0x4a8   :  { %1418 = vrot.lane.b32.xlu0 %v1417_v43, %s1647_s9 }
 0x4a9   :  { %v672_v44 = vpop.f32.mrb[12].mxu1 }
 0x4aa   :  { %v1381_v46 = vpop.f32.mrb[13].mxu1  ;;  %v681_v49 = vmul.f32 %v1512_v45, %v672_v44 }
 0x4ab   :  { %v675_v48 = vpop.f32.mrb[14].mxu1  ;;  %v1253_v46 = vld [vmem:[%s2026_s6] ss:$0 sm:$0xff] }
 0x4ac   :  { %v682_v50 = vmul.f32 %v1514_v47, %v675_v48  ;;  %v1382_v51 = vpop.f32.mrb[15].mxu1 }
 0x4ad   :  { %v1467_v51 = vld [vmem:[%s2024_s4 + $0x40] sm:$0xff]  }
 0x4ae   :  { %v1422_v52 = vpack.i.bf16 %v682_v50, %v681_v49 }
 0x4b0   :  { %1423 = vrot.lane.b32.xlu1 %v1422_v52, %s1643_s7  ;;  %v1468_v52 = vld [vmem:[%s2024_s4] sm:$0xff]  }
 0x512   :  { %v1414_v54 = vpop.permute.xlu1 %1413 }
 0x513   :  { %v1416_v57 = vunpack.i.h.bf16 %v1414_v54  ;;  %v1415_v58 = vunpack.i.l.bf16 %v1414_v54  ;;  %v1471_v54 = vld [vmem:[%s2024_s4 + $0x50] sm:$0xff]  }
 0x515   :  { %v708_v3 = vsel %vm218_vm2, %v335_v63, %v1416_v57  ;;  %v707_v4 = vsel %vm218_vm2, %v334_v62, %v1415_v58  ;;  %v1474_v57 = vld [vmem:[%s2024_s4 + $0x18] sm:$0xff]   ;;  %v1475_v58 = vld [vmem:[%s2024_s4 + $0x60] sm:$0xff]   ;;  %v1479_v62 = vld [vmem:[%s2024_s4 + $0x70] sm:$0xff]  }
 0x516   :  { %v1480_v63 = vld [vmem:[%s2024_s4 + $0x30] sm:$0xff]  }
 0x51a   :  { %v1419_v55 = vpop.permute.xlu0 %1418 }
 0x51b   :  { %v1421_v60 = vunpack.i.h.bf16 %v1419_v55  ;;  %v1420_v61 = vunpack.i.l.bf16 %v1419_v55  ;;  %v1472_v55 = vld [vmem:[%s2024_s4 + $0x10] sm:$0xff]  }
 0x51d   :  { %v710_v7 = vsel %vm709_vm3, %v707_v4, %v1420_v61  ;;  %v711_v8 = vsel %vm709_vm3, %v708_v3, %v1421_v60  ;;  %v1477_v60 = vld [vmem:[%s2024_s4 + $0x68] sm:$0xff]   ;;  %v1482_v3 = vld [vmem:[%s2024_s4 + $0x38] sm:$0xff]  }
 0x51e   :  { %v1478_v61 = vld [vmem:[%s2024_s4 + $0x28] sm:$0xff]  }
 0x522   :  { %v1424_v2 = vpop.permute.xlu1 %1423 }
 0x523   :  { %v1426_v5 = vunpack.i.h.bf16 %v1424_v2  ;;  %v1425_v6 = vunpack.i.l.bf16 %v1424_v2  ;;  %v1481_v2 = vld [vmem:[%s2024_s4 + $0x78] sm:$0xff]   ;;  %s1649_s4 = smov [#allocation8]  }
 0x524   :  { %s1217_s0 = sshll.u32 %s1649_s4, 4  ;;  %s1218_s0 = int_to_ptr.vmem [resolvable:$true] %s1217_s0 }
 0x525   :  { %v713_v9 = vsel %vm712_vm4, %v710_v7, %v1425_v6  ;;  %v714_v10 = vsel %vm712_vm4, %v711_v8, %v1426_v5  ;;  %s1605_s28 = scalar_lea.vmem %s1218_s0, 256  ;;  %p1610_p11 = scmp.lt.s32.totalorder %s1218_s0, %s1218_s0 }
 0x526   :  { %v715_v12 = vpack.c.bf16 %v714_v10, %v713_v9  ;;  %p1606_p10 = scmp.ne.s32.totalorder %s1218_s0, %s1605_s28  ;;  %p1611_p12 = scmp.lt.s32.totalorder %s1605_s28, %s1605_s28 }
 0x528   :  { %1392 = vmatmul.mubr.msk.bf16.vlgmr.msra.gmra.mrb[20].mxu0 %vm83_vm0, %v715_v12  ;;  %p1612_p13 = por %p1611_p12, %p1610_p11 }
 0x529   :  { %994 = vmatprep.mubr.bf16.mxu0 %v1640_v11 }
 0x52a   :  { %p1613_p0 = pnand %p1612_p13, %p1606_p10 }
 0x5fb   :  { %v785_v13 = vpop.f32.mrb[20].mxu0 }
 0x5fc   :  { %v1887_v14 = vadd.f32 %v785_v13, %v1749_v0  ;;  %v1393_v15 = vpop.f32.mrb[21].mxu0  ;;  %v1445_v0 = vld [vmem:[%s2023_s3 + $0x4] ss:$16 sps:$4 sm:$0xff]  }
 0x5fd   :  { %v788_v16 = vpop.f32.mrb[22].mxu0  ;;  %919 = vmatprep.subr.bf16.mxu1 %v1445_v0 }
 0x5fe   :  { %v1890_v17 = vadd.f32 %v788_v16, %v1751_v1  ;;  %v1394_v18 = vpop.f32.mrb[23].mxu0  ;;  %v795_v19 = vmul.f32 %v1887_v14, %v1887_v14  ;;  %v1448_v1 = vld [vmem:[%s2023_s3 + $0xc] ss:$16 sps:$4 sm:$0xff]   ;;  %920 = vmatpush1.bf16.msra.mxu1 %v1443_v22 }
 0x5ff   :  { %962 = vmatprep.subr.bf16.mxu0 %v1448_v1  ;;  %921 = vmatprep.subr.bf16.mxu1 %v1451_v24 }
 0x600   :  { %v797_v20 = vsel %vm83_vm0, %v795_v19, 0.0  ;;  %v796_v21 = vmul.f32 %v1890_v17, %v1890_v17  ;;  %963 = vmatpush1.bf16.msra.mxu0 %v1446_v23 }
 0x601   :  { %798 = vadd.xlane.f32.xlu1 %v797_v20  ;;  %964 = vmatprep.subr.bf16.mxu0 %v1454_v25 }
 0x602   :  { %v800_v11 = vsel %vm83_vm0, %v796_v21, 0.0  ;;  %922 = vmatpush1.bf16.msra.mxu1 %v1449_v26 }
 0x603   :  { %801 = vadd.xlane.f32.xlu0 %v800_v11  ;;  %923 = vmatprep.subr.bf16.mxu1 %v1457_v28 }
 0x604   :  { %965 = vmatpush1.bf16.msra.mxu0 %v1452_v27 }
 0x605   :  { %966 = vmatprep.subr.bf16.mxu0 %v1460_v30 }
 0x606   :  { %924 = vmatpush1.bf16.msra.mxu1 %v1455_v31 }
 0x607   :  { %925 = vmatprep.subr.bf16.mxu1 %v1463_v33 }
 0x608   :  { %967 = vmatpush1.bf16.msra.mxu0 %v1458_v32 }
 0x609   :  { %968 = vmatprep.subr.bf16.mxu0 %v1466_v34 }
 0x60a   :  { %926 = vmatpush1.bf16.msra.mxu1 %v1461_v35 }
 0x60b   :  { %1313 = vmatprep.subr.bf16.mxu1 %v1467_v51 }
 0x60c   :  { %969 = vmatpush1.bf16.msra.mxu0 %v1464_v36 }
 0x68e   :  { %v799_v37 = vpop.xlane.xlu1 %798 }
 0x68f   :  { %v803_v38 = vmul.f32 0.015625, %v799_v37 }
 0x690   :  { %v802_v39 = vpop.xlane.xlu0 %801 }
 0x691   :  { %v805_v40 = vadd.f32 1e-05, %v803_v38  ;;  %v804_v41 = vmul.f32 0.015625, %v802_v39 }
 0x693   :  { %1519 = vrsqrt.f32 %v805_v40  ;;  %v806_v42 = vadd.f32 1e-05, %v804_v41 }
 0x695   :  { %1521 = vrsqrt.f32 %v806_v42 }
 0x69d   :  { %v1520_v43 = vpop.eup %1519 }
 0x69e   :  { %v809_v44 = vmul.f32 %v1520_v43, %v1887_v14 }
 0x69f   :  { %v1522_v45 = vpop.eup %1521 }
 0x6a0   :  { %v810_v47 = vmul.f32 %v1522_v45, %v1890_v17  ;;  %v817_v48 = vmul.f32 %v1253_v46, %v809_v44 }
 0x6a2   :  { %v818_v49 = vmul.f32 %v1253_v46, %v810_v47 }
 0x6a4   :  { %v819_v50 = vpack.c.bf16 %v818_v49, %v817_v48 }
 0x6a6   :  { %1270 = vmatmul.mubr.msk.bf16.vlgmr.msra.gmra.mrb[16].mxu1 %vm83_vm0, %v819_v50  ;;  %1271 = vmatmul.mubr.msk.bf16.vlgmr.msra.gmra.mrb[24].mxu0 %vm83_vm0, %v819_v50 }
 0x6a7   :  { %1314 = vmatpush3.bf16.msra.mxu1 %v1468_v52 }
 0x6a8   :  { %1315 = vmatprep.subr.bf16.mxu1 %v1469_v29 }
 0x6ab   :  { %1316 = vmatpush3.bf16.msra.mxu1 %v1470_v53 }
 0x6ac   :  { %1317 = vmatprep.subr.bf16.mxu1 %v1471_v54 }
 0x6af   :  { %1318 = vmatpush3.bf16.msra.mxu1 %v1472_v55 }
 0x6b0   :  { %1319 = vmatprep.subr.bf16.mxu1 %v1473_v56 }
 0x6b3   :  { %1320 = vmatpush3.bf16.msra.mxu1 %v1474_v57 }
 0x6b4   :  { %1321 = vmatprep.subr.bf16.mxu1 %v1475_v58 }
 0x6b7   :  { %1322 = vmatpush3.bf16.msra.mxu1 %v1476_v59 }
 0x6b8   :  { %1323 = vmatprep.subr.bf16.mxu1 %v1477_v60 }
 0x6bb   :  { %1324 = vmatpush3.bf16.msra.mxu1 %v1478_v61 }
 0x6bc   :  { %1325 = vmatprep.subr.bf16.mxu1 %v1479_v62 }
 0x6bf   :  { %1326 = vmatpush3.bf16.msra.mxu1 %v1480_v63 }
 0x6c0   :  { %1327 = vmatprep.subr.bf16.mxu1 %v1481_v2 }
 0x6c3   :  { %1328 = vmatpush3.bf16.msra.mxu1 %v1482_v3 }
 0x779   :  { %v953_v4 = vpop.f32.mrb[16].mxu1  ;;  %v996_v5 = vpop.f32.mrb[24].mxu0 }
 0x77a   :  { %v1272_v6 = vmul.f32 -1.442695, %v953_v4  ;;  %v955_v7 = vpop.f32.mrb[17].mxu1  ;;  %v998_v8 = vpop.f32.mrb[25].mxu0 }
 0x77b   :  { %v1273_v9 = vmul.f32 -1.442695, %v955_v7  ;;  %v957_v10 = vpop.f32.mrb[18].mxu1  ;;  %v1000_v12 = vpop.f32.mrb[26].mxu0 }
 0x77c   :  { %1523 = vpow2.f32 %v1272_v6  ;;  %v1274_v13 = vmul.f32 -1.442695, %v957_v10  ;;  %v959_v15 = vpop.f32.mrb[19].mxu1  ;;  %v1002_v16 = vpop.f32.mrb[27].mxu0 }
 0x77d   :  { %1525 = vpow2.f32 %v1273_v9  ;;  %v1275_v18 = vmul.f32 -1.442695, %v959_v15 }
 0x77e   :  { %1527 = vpow2.f32 %v1274_v13 }
 0x77f   :  { %1529 = vpow2.f32 %v1275_v18 }
 0x786   :  { %v1524_v19 = vpop.eup %1523 }
 0x787   :  { %v1526_v20 = vpop.eup %1525  ;;  %v1017_v21 = vadd.f32 1.0, %v1524_v19 }
 0x788   :  { %v1528_v11 = vpop.eup %1527  ;;  %v1018_v0 = vadd.f32 1.0, %v1526_v20 }
 0x789   :  { %v1530_v1 = vpop.eup %1529  ;;  %1531 = vrcp.f32 %v1017_v21  ;;  %v1019_v22 = vadd.f32 1.0, %v1528_v11 }
 0x78a   :  { %1533 = vrcp.f32 %v1018_v0  ;;  %v1020_v23 = vadd.f32 1.0, %v1530_v1 }
 0x78b   :  { %1535 = vrcp.f32 %v1019_v22 }
 0x78c   :  { %1537 = vrcp.f32 %v1020_v23 }
 0x793   :  { %v1532_v24 = vpop.eup %1531 }
 0x794   :  { %v1534_v25 = vpop.eup %1533  ;;  %v1029_v26 = vmul.f32 %v1532_v24, %v953_v4 }
 0x795   :  { %v1536_v27 = vpop.eup %1535  ;;  %v1030_v28 = vmul.f32 %v1534_v25, %v955_v7 }
 0x796   :  { %v1538_v30 = vpop.eup %1537  ;;  %v1033_v31 = vmul.f32 %v1029_v26, %v996_v5  ;;  %v1031_v32 = vmul.f32 %v1536_v27, %v957_v10 }
 0x797   :  { %v1034_v33 = vmul.f32 %v1030_v28, %v998_v8  ;;  %v1032_v34 = vmul.f32 %v1538_v30, %v959_v15 }
 0x798   :  { %v1035_v35 = vmul.f32 %v1031_v32, %v1000_v12 }
 0x799   :  { %v1036_v36 = vmul.f32 %v1032_v34, %v1002_v16 }
 0x79a   :  { %v1037_v37 = vpack.c.bf16 %v1035_v35, %v1033_v31 }
 0x79b   :  { %v1038_v38 = vpack.c.bf16 %v1036_v36, %v1034_v33 }
 0x79d   :  { %1199 = vmatprep.mubr.bf16.mxu1 %v1038_v38 }
 0x79e   :  { %1200 = vmatmul.mubr.bf16.vlgmr.msra.gmra.mrb[20].mxu1 %v1037_v37 }
 0x871   :  { %v1329_v39 = vpop.f32.mrb[20].mxu1 }
 0x872   :  { %v1330_v40 = vpop.f32.mrb[21].mxu1 }
 0x873   :  { %v1331_v41 = vadd.f32 %v1330_v40, %v1329_v39  ;;  %v1332_v42 = vpop.f32.mrb[22].mxu1 }
 0x874   :  { %v1333_v43 = vpop.f32.mrb[23].mxu1 }
 0x875   :  { %v1208_v44 = vadd.f32 %v1331_v41, %v1887_v14  ;;  %v1334_v45 = vadd.f32 %v1333_v43, %v1332_v42 }
 0x877   :  { %1210 = vst.msk [vmem:[#allocation8] sm:$0xff] %vm83_vm0, %v1208_v44  ;;  %v1209_v46 = vadd.f32 %v1334_v45, %v1890_v17 }
 0x879   :  { %1211 = vst.msk [vmem:[#allocation8 + $0x8] sm:$0xff] %vm83_vm0, %v1209_v46 }
 0x87a   :  { %1616 = shalt.err (!%p1613_p0)
}
 0x87b   :  { %s1617_s8 = scalar_lea.hbm %s2030_s10, 256 }
 0x87c   :  { %p1618_p1 = scmp.ne.s32.totalorder %s2030_s10, %s1617_s8  ;;  %p1621_p2 = scmp.lt.u32.totalorder %s1617_s8, %s2030_s10 }
 0x87e   :  { %p1623_p3 = pnand %p1621_p2, %p1618_p1 }
 0x880   :  { %1626 = shalt.err (!%p1623_p3)
}
 0x881   :  { %1223 = dma.vmem_to_hbm [thread:$0]  %s1218_s0, 256, %s2030_s10, [#allocation4], %s1637_s2, %s1637_s2, %s1638_s14  }
 0x882   :  { %1631 = dma.done.wait [#allocation4], 256  }
 0x883   :  { %1632 = vsyncadd [#allocation4], 4294967040 }
 0x884   :  { %1227 = vsyncpa [#allocation3], 1 }
 0x885   :  { %1228 = vsyncpa [#allocation6], 1 }
 0x886   :  { %1229 = vsyncpa [#allocation4], 1 }

</bundles_post_ra>
